<compile_context>
chip_gen: v5e
topology: v5e:2x2
jax: 0.10.0
libtpu: 0.0.40
codegen_flags: <defaults>
</compile_context>

<pallas_src>
import math

import jax
import jax.numpy as jnp
from jax import lax
from jax.experimental import pallas as pl
from jax.experimental.pallas import tpu as pltpu


# (output-row parity a, padded-row tap offset dr) -> kernel row kh, derived from
#   oh = 2*ih - 1 + kh  (stride 2, padding 1, kernel 4).  Same table for columns.
# Valid taps per parity: a=0 -> dr in {0,1};  a=1 -> dr in {1,2}  (i.e. {a, a+1}).
_KTAP = {(0, 0): 3, (0, 1): 1, (1, 1): 2, (1, 2): 0}


def _round_up(v, m):
    return (v + m - 1) // m * m


# ---------------------------------------------------------------------------
# Pallas kernel: per-phase slab GEMMs + bias from one resident im2col tile.
# ---------------------------------------------------------------------------
def _deconv_phase_kernel(w_ref, b_ref, x_ref, o_ref):
    # w_ref: (8, C_out, 2*C_in) bf16  — slab s = 2*(2a+b)+si, resident
    # b_ref: (C_out, 1)         f32  — bias, resident
    # x_ref: (9*C_in, TN)       bf16 — im2col column tile (tap-major, ch-minor)
    # o_ref: (4*C_out, TN)      f32  — phase-major output tile (lane-dense)
    c_out = w_ref.shape[1]
    c_in = w_ref.shape[2] // 2
    bias = b_ref[...]  # (C_out, 1), broadcasts over TN
    for a in (0, 1):
        for b in (0, 1):
            ab = 2 * a + b
            # Phase (a,b) only touches taps (dr,dc) with dr in {a,a+1},
            # dc in {b,b+1}: two contiguous 2*C_in K-slabs of the x tile.
            s0 = (3 * a + b) * c_in
            s1 = (3 * (a + 1) + b) * c_in
            acc = jnp.dot(w_ref[2 * ab + 0], x_ref[s0:s0 + 2 * c_in, :],
                          preferred_element_type=jnp.float32)
            acc = acc + jnp.dot(w_ref[2 * ab + 1], x_ref[s1:s1 + 2 * c_in, :],
                                preferred_element_type=jnp.float32)
            o_ref[ab * c_out:(ab + 1) * c_out, :] = (acc + bias).astype(o_ref.dtype)


# ---------------------------------------------------------------------------
# One-time parameter packing (hoisted out of the forward).
# ---------------------------------------------------------------------------
def _pack_weights(w):
    """PyTorch ConvTranspose2d weight (C_in, C_out, 4, 4) -> (8, C_out, 2*C_in).

    Slab index s = 2*(2a+b) + si covers taps (dr=a+si, dc in {b, b+1});
    columns are tap-major (j), channel-minor (ci): col = j*C_in + ci.
    """
    c_in, c_out, _, _ = w.shape
    slabs = []
    for a in (0, 1):
        for b in (0, 1):
            for si in (0, 1):
                kh = _KTAP[(a, a + si)]
                slab = jnp.concatenate(
                    [w[:, :, kh, _KTAP[(b, b + j)]].T for j in (0, 1)], axis=1)
                slabs.append(slab)  # (C_out, 2*C_in)
    return jnp.stack(slabs, axis=0)


def prepare_params(params):
    """Pack once at init time; the forward only consumes the packed arrays."""
    return {
        "w_slab": _pack_weights(params["w"].astype(jnp.float32)).astype(jnp.bfloat16),
        "b_col": params["b"].astype(jnp.float32).reshape(-1, 1),
    }


# ---------------------------------------------------------------------------
# Tiling / VMEM sizing (generation-safe: total kept well under v7x's 64 MiB).
# ---------------------------------------------------------------------------
def _pick_col_tile(nhw, c_in, c_out, budget_bytes=28 << 20):
    # Per-column bytes: double-buffered bf16 x-tile + double-buffered f32 out-tile.
    per_col = 2 * (9 * c_in * 2) + 2 * (4 * c_out * 4)
    # Resident weights/bias (BlockSpec double-buffers them too -> count 2x).
    resident = 2 * (8 * c_out * 2 * c_in * 2 + c_out * 4)
    avail = max(budget_bytes - resident, per_col * 128)
    tn = min(avail // per_col, 4096)
    tn = max(tn // 128 * 128, 128)
    return min(tn, _round_up(nhw, 128))


# ---------------------------------------------------------------------------
# Forward: ConvTranspose2d(C, C, (4,4), (2,2), (1,1)); t is ignored.
# ---------------------------------------------------------------------------
def upsample(x, t, packed):
    del t  # matches `_ = t` in the PyTorch forward
    w_slab = packed["w_slab"]            # (8, C_out, 2*C_in) bf16
    b_col = packed["b_col"]              # (C_out, 1) f32
    n, c_in, h, wd = x.shape
    c_out = w_slab.shape[1]
    nhw = n * h * wd

    # --- wrapper layout plumbing: zero-pad + 9-tap im2col (bf16) -------------
    # TODO(synk): build this in-kernel from a halo-padded input to drop the
    # 9x-expanded HBM copy (largest remaining mem-bound lever).
    xb = x.astype(jnp.bfloat16)
    xp = jnp.pad(xb, ((0, 0), (0, 0), (1, 1), (1, 1)))
    taps = [xp[:, :, dr:dr + h, dc:dc + wd] for dr in range(3) for dc in range(3)]
    x9 = jnp.stack(taps, axis=1)                               # (N, 9, C, H, W)
    x9 = x9.transpose(1, 2, 0, 3, 4).reshape(9 * c_in, nhw)    # (9*C, N*H*W)

    tn = _pick_col_tile(nhw, c_in, c_out)
    nhw_p = _round_up(nhw, tn)                                 # lane-dense columns
    if nhw_p != nhw:
        x9 = jnp.pad(x9, ((0, 0), (0, nhw_p - nhw)))

    m = 4 * c_out
    k9 = 9 * c_in

    # VMEM limit from actual double-buffered footprint (+25% margin), capped so
    # it stays under v7x's 64 MiB physical VMEM.
    vmem_need = (2 * (k9 * tn * 2 + m * tn * 4)
                 + 2 * (w_slab.size * 2 + c_out * 4))
    vmem_limit = int(min(max(vmem_need * 5 // 4, 4 << 20), 48 << 20))

    y_flat = pl.pallas_call(
        _deconv_phase_kernel,
        out_shape=jax.ShapeDtypeStruct((m, nhw_p), jnp.float32),
        grid=(nhw_p // tn,),
        in_specs=[
            pl.BlockSpec((8, c_out, 2 * c_in), lambda j: (0, 0, 0)),  # weights, resident
            pl.BlockSpec((c_out, 1), lambda j: (0, 0)),               # bias, resident
            pl.BlockSpec((k9, tn), lambda j: (0, j)),                 # im2col columns
        ],
        out_specs=pl.BlockSpec((m, tn), lambda j: (0, j)),
        compiler_params=pltpu.CompilerParams(
            dimension_semantics=("parallel",),
            vmem_limit_bytes=vmem_limit,
        ),
    )(w_slab, b_col, x9)

    # --- sub-pixel interleave: (a, b, co, n, i, j) -> (n, co, 2i+a, 2j+b) ----
    # TODO(synk): fuse this permute into the consumer (or do the width-parity
    # interleave in-kernel via pltpu.bitcast packing) to avoid an extra full
    # HBM pass over the upsampled tensor.
    y = y_flat[:, :nhw].reshape(2, 2, c_out, n, h, wd)
    y = y.transpose(3, 2, 4, 0, 5, 1).reshape(n, c_out, 2 * h, 2 * wd)
    return y


# ---------------------------------------------------------------------------
# Init + pure-JAX reference.
# ---------------------------------------------------------------------------
def init_params(key, n_channels):
    """Deterministic init mimicking nn.ConvTranspose2d (uniform +-1/sqrt(fan_in))."""
    k1, k2 = jax.random.split(key)
    bound = 1.0 / math.sqrt(n_channels * 4 * 4)
    return {
        # PyTorch ConvTranspose2d weight layout: (in_channels, out_channels, kH, kW)
        "w": jax.random.uniform(k1, (n_channels, n_channels, 4, 4),
                                jnp.float32, -bound, bound),
        "b": jax.random.uniform(k2, (n_channels,), jnp.float32, -bound, bound),
    }


def reference(x, params):
    """Pure-JAX reference mirroring PyTorch ConvTranspose2d(C,C,(4,4),(2,2),(1,1))."""
    w = params["w"].astype(jnp.float32)
    b = params["b"].astype(jnp.float32)
    w_oihw = jnp.transpose(w[:, :, ::-1, ::-1], (1, 0, 2, 3))  # (C_out, C_in, 4, 4)
    y = lax.conv_general_dilated(
        x.astype(jnp.float32), w_oihw,
        window_strides=(1, 1),
        padding=((2, 2), (2, 2)),
        lhs_dilation=(2, 2),
        dimension_numbers=("NCHW", "OIHW", "NCHW"),
        precision=lax.Precision.HIGHEST)
    return y + b[None, :, None, None]


if __name__ == "__main__":
    n_channels, batch, spatial = 4, 2, 16

    key = jax.random.PRNGKey(0)
    kp, kx = jax.random.split(key)
    params = init_params(kp, n_channels)
    packed = prepare_params(params)   # packed once, not inside every forward
    x = jax.random.normal(kx, (batch, n_channels, spatial, spatial), jnp.float32)
    t = jnp.zeros((batch,), jnp.float32)   # unused by the module's forward

    out = jax.jit(upsample)(x, t, packed)
    out = jax.block_until_ready(out)

    ref = reference(x, params)
    assert out.shape == (batch, n_channels, 2 * spatial, 2 * spatial), out.shape
    max_err = float(jnp.max(jnp.abs(out - ref)))
    # bf16 GEMM operands with f32 accumulation: tolerance sized for bf16 rounding.
    assert max_err < 4e-2, f"max abs err {max_err}"

    print("KERNEL_OK")
</pallas_src>

<mosaic_0001>
module attributes {stable_mosaic.version = 11 : i64} {
  func.func @_deconv_phase_kernel(%arg0: i32, %arg1: memref<8x4x8xbf16, #tpu.memory_space<vmem>>, %arg2: memref<4x1xf32, #tpu.memory_space<vmem>>, %arg3: memref<36x512xbf16, #tpu.memory_space<vmem>>, %arg4: memref<16x512xf32, #tpu.memory_space<vmem>>) attributes {dimension_semantics = [#tpu.dimension_semantics<parallel>], iteration_bounds = array<i64: 1>, scalar_prefetch = 0 : i64, scratch_operands = 0 : i64, tpu.core_type = #tpu.core_type<tc>, window_params = [{pipeline_mode = #tpu.pipeline_mode<synchronous>, transform_indices = @transform_0, window_bounds = array<i64: 8, 4, 8>}, {pipeline_mode = #tpu.pipeline_mode<synchronous>, transform_indices = @transform_1, window_bounds = array<i64: 4, 1>}, {transform_indices = @transform_2, window_bounds = array<i64: 36, 512>}, {transform_indices = @transform_3, window_bounds = array<i64: 16, 512>}]} {
    %c0 = arith.constant 0 : index
    %c0_0 = arith.constant 0 : index
    %0 = vector.load %arg2[%c0, %c0_0] : memref<4x1xf32, #tpu.memory_space<vmem>>, vector<4x1xf32>
    %c0_1 = arith.constant 0 : index
    %c0_2 = arith.constant 0 : index
    %c0_3 = arith.constant 0 : index
    %1 = vector.load %arg1[%c0_1, %c0_2, %c0_3] : memref<8x4x8xbf16, #tpu.memory_space<vmem>>, vector<1x4x8xbf16>
    %2 = vector.shape_cast %1 : vector<1x4x8xbf16> to vector<4x8xbf16>
    %c0_4 = arith.constant 0 : index
    %c0_5 = arith.constant 0 : index
    %3 = vector.load %arg3[%c0_4, %c0_5] : memref<36x512xbf16, #tpu.memory_space<vmem>>, vector<8x512xbf16>
    %cst = arith.constant dense<0.000000e+00> : vector<4x512xf32>
    %4 = tpu.matmul %2, %3, %cst {dimension_numbers = #tpu.dot_dimension_numbers<[1], [0], [0], [1], [0, 0, 1, 1], [], []>} : vector<4x8xbf16>, vector<8x512xbf16>, vector<4x512xf32> -> vector<4x512xf32>
    %c1 = arith.constant 1 : index
    %c0_6 = arith.constant 0 : index
    %c0_7 = arith.constant 0 : index
    %5 = vector.load %arg1[%c1, %c0_6, %c0_7] : memref<8x4x8xbf16, #tpu.memory_space<vmem>>, vector<1x4x8xbf16>
    %6 = vector.shape_cast %5 : vector<1x4x8xbf16> to vector<4x8xbf16>
    %c12 = arith.constant 12 : index
    %c0_8 = arith.constant 0 : index
    %7 = vector.load %arg3[%c12, %c0_8] : memref<36x512xbf16, #tpu.memory_space<vmem>>, vector<8x512xbf16>
    %cst_9 = arith.constant dense<0.000000e+00> : vector<4x512xf32>
    %8 = tpu.matmul %6, %7, %cst_9 {dimension_numbers = #tpu.dot_dimension_numbers<[1], [0], [0], [1], [0, 0, 1, 1], [], []>} : vector<4x8xbf16>, vector<8x512xbf16>, vector<4x512xf32> -> vector<4x512xf32>
    %9 = arith.addf %4, %8 : vector<4x512xf32>
    %10 = vector.broadcast %0 : vector<4x1xf32> to vector<4x512xf32>
    %11 = arith.addf %9, %10 : vector<4x512xf32>
    %c0_10 = arith.constant 0 : index
    %c0_11 = arith.constant 0 : index
    %12 = vector.load %arg4[%c0_10, %c0_11] : memref<16x512xf32, #tpu.memory_space<vmem>>, vector<4x512xf32>
    tpu.vector_store %arg4[%c0_10, %c0_11], %11 {strides = array<i32>} : memref<16x512xf32, #tpu.memory_space<vmem>>, vector<4x512xf32>,
    %c2 = arith.constant 2 : index
    %c0_12 = arith.constant 0 : index
    %c0_13 = arith.constant 0 : index
    %13 = vector.load %arg1[%c2, %c0_12, %c0_13] : memref<8x4x8xbf16, #tpu.memory_space<vmem>>, vector<1x4x8xbf16>
    %14 = vector.shape_cast %13 : vector<1x4x8xbf16> to vector<4x8xbf16>
    %c4 = arith.constant 4 : index
    %c0_14 = arith.constant 0 : index
    %15 = vector.load %arg3[%c4, %c0_14] : memref<36x512xbf16, #tpu.memory_space<vmem>>, vector<8x512xbf16>
    %cst_15 = arith.constant dense<0.000000e+00> : vector<4x512xf32>
    %16 = tpu.matmul %14, %15, %cst_15 {dimension_numbers = #tpu.dot_dimension_numbers<[1], [0], [0], [1], [0, 0, 1, 1], [], []>} : vector<4x8xbf16>, vector<8x512xbf16>, vector<4x512xf32> -> vector<4x512xf32>
    %c3 = arith.constant 3 : index
    %c0_16 = arith.constant 0 : index
    %c0_17 = arith.constant 0 : index
    %17 = vector.load %arg1[%c3, %c0_16, %c0_17] : memref<8x4x8xbf16, #tpu.memory_space<vmem>>, vector<1x4x8xbf16>
    %18 = vector.shape_cast %17 : vector<1x4x8xbf16> to vector<4x8xbf16>
    %c16 = arith.constant 16 : index
    %c0_18 = arith.constant 0 : index
    %19 = vector.load %arg3[%c16, %c0_18] : memref<36x512xbf16, #tpu.memory_space<vmem>>, vector<8x512xbf16>
    %cst_19 = arith.constant dense<0.000000e+00> : vector<4x512xf32>
    %20 = tpu.matmul %18, %19, %cst_19 {dimension_numbers = #tpu.dot_dimension_numbers<[1], [0], [0], [1], [0, 0, 1, 1], [], []>} : vector<4x8xbf16>, vector<8x512xbf16>, vector<4x512xf32> -> vector<4x512xf32>
    %21 = arith.addf %16, %20 : vector<4x512xf32>
    %22 = vector.broadcast %0 : vector<4x1xf32> to vector<4x512xf32>
    %23 = arith.addf %21, %22 : vector<4x512xf32>
    %c4_20 = arith.constant 4 : index
    %c0_21 = arith.constant 0 : index
    %24 = vector.load %arg4[%c4_20, %c0_21] : memref<16x512xf32, #tpu.memory_space<vmem>>, vector<4x512xf32>
    tpu.vector_store %arg4[%c4_20, %c0_21], %23 {strides = array<i32>} : memref<16x512xf32, #tpu.memory_space<vmem>>, vector<4x512xf32>,
    %c4_22 = arith.constant 4 : index
    %c0_23 = arith.constant 0 : index
    %c0_24 = arith.constant 0 : index
    %25 = vector.load %arg1[%c4_22, %c0_23, %c0_24] : memref<8x4x8xbf16, #tpu.memory_space<vmem>>, vector<1x4x8xbf16>
    %26 = vector.shape_cast %25 : vector<1x4x8xbf16> to vector<4x8xbf16>
    %c12_25 = arith.constant 12 : index
    %c0_26 = arith.constant 0 : index
    %27 = vector.load %arg3[%c12_25, %c0_26] : memref<36x512xbf16, #tpu.memory_space<vmem>>, vector<8x512xbf16>
    %cst_27 = arith.constant dense<0.000000e+00> : vector<4x512xf32>
    %28 = tpu.matmul %26, %27, %cst_27 {dimension_numbers = #tpu.dot_dimension_numbers<[1], [0], [0], [1], [0, 0, 1, 1], [], []>} : vector<4x8xbf16>, vector<8x512xbf16>, vector<4x512xf32> -> vector<4x512xf32>
    %c5 = arith.constant 5 : index
    %c0_28 = arith.constant 0 : index
    %c0_29 = arith.constant 0 : index
    %29 = vector.load %arg1[%c5, %c0_28, %c0_29] : memref<8x4x8xbf16, #tpu.memory_space<vmem>>, vector<1x4x8xbf16>
    %30 = vector.shape_cast %29 : vector<1x4x8xbf16> to vector<4x8xbf16>
    %c24 = arith.constant 24 : index
    %c0_30 = arith.constant 0 : index
    %31 = vector.load %arg3[%c24, %c0_30] : memref<36x512xbf16, #tpu.memory_space<vmem>>, vector<8x512xbf16>
    %cst_31 = arith.constant dense<0.000000e+00> : vector<4x512xf32>
    %32 = tpu.matmul %30, %31, %cst_31 {dimension_numbers = #tpu.dot_dimension_numbers<[1], [0], [0], [1], [0, 0, 1, 1], [], []>} : vector<4x8xbf16>, vector<8x512xbf16>, vector<4x512xf32> -> vector<4x512xf32>
    %33 = arith.addf %28, %32 : vector<4x512xf32>
    %34 = vector.broadcast %0 : vector<4x1xf32> to vector<4x512xf32>
    %35 = arith.addf %33, %34 : vector<4x512xf32>
    %c8 = arith.constant 8 : index
    %c0_32 = arith.constant 0 : index
    %36 = vector.load %arg4[%c8, %c0_32] : memref<16x512xf32, #tpu.memory_space<vmem>>, vector<4x512xf32>
    tpu.vector_store %arg4[%c8, %c0_32], %35 {strides = array<i32>} : memref<16x512xf32, #tpu.memory_space<vmem>>, vector<4x512xf32>,
    %c6 = arith.constant 6 : index
    %c0_33 = arith.constant 0 : index
    %c0_34 = arith.constant 0 : index
    %37 = vector.load %arg1[%c6, %c0_33, %c0_34] : memref<8x4x8xbf16, #tpu.memory_space<vmem>>, vector<1x4x8xbf16>
    %38 = vector.shape_cast %37 : vector<1x4x8xbf16> to vector<4x8xbf16>
    %c16_35 = arith.constant 16 : index
    %c0_36 = arith.constant 0 : index
    %39 = vector.load %arg3[%c16_35, %c0_36] : memref<36x512xbf16, #tpu.memory_space<vmem>>, vector<8x512xbf16>
    %cst_37 = arith.constant dense<0.000000e+00> : vector<4x512xf32>
    %40 = tpu.matmul %38, %39, %cst_37 {dimension_numbers = #tpu.dot_dimension_numbers<[1], [0], [0], [1], [0, 0, 1, 1], [], []>} : vector<4x8xbf16>, vector<8x512xbf16>, vector<4x512xf32> -> vector<4x512xf32>
    %c7 = arith.constant 7 : index
    %c0_38 = arith.constant 0 : index
    %c0_39 = arith.constant 0 : index
    %41 = vector.load %arg1[%c7, %c0_38, %c0_39] : memref<8x4x8xbf16, #tpu.memory_space<vmem>>, vector<1x4x8xbf16>
    %42 = vector.shape_cast %41 : vector<1x4x8xbf16> to vector<4x8xbf16>
    %c28 = arith.constant 28 : index
    %c0_40 = arith.constant 0 : index
    %43 = vector.load %arg3[%c28, %c0_40] : memref<36x512xbf16, #tpu.memory_space<vmem>>, vector<8x512xbf16>
    %cst_41 = arith.constant dense<0.000000e+00> : vector<4x512xf32>
    %44 = tpu.matmul %42, %43, %cst_41 {dimension_numbers = #tpu.dot_dimension_numbers<[1], [0], [0], [1], [0, 0, 1, 1], [], []>} : vector<4x8xbf16>, vector<8x512xbf16>, vector<4x512xf32> -> vector<4x512xf32>
    %45 = arith.addf %40, %44 : vector<4x512xf32>
    %46 = vector.broadcast %0 : vector<4x1xf32> to vector<4x512xf32>
    %47 = arith.addf %45, %46 : vector<4x512xf32>
    %c12_42 = arith.constant 12 : index
    %c0_43 = arith.constant 0 : index
    %48 = vector.load %arg4[%c12_42, %c0_43] : memref<16x512xf32, #tpu.memory_space<vmem>>, vector<4x512xf32>
    tpu.vector_store %arg4[%c12_42, %c0_43], %47 {strides = array<i32>} : memref<16x512xf32, #tpu.memory_space<vmem>>, vector<4x512xf32>,
    return
  }
  func.func @transform_0(%arg0: i32) -> (i32, i32, i32) {
    %c0_i32 = arith.constant 0 : i32
    %c0_i32_0 = arith.constant 0 : i32
    %c0_i32_1 = arith.constant 0 : i32
    %c0_i32_2 = arith.constant 0 : i32
    return %c0_i32, %c0_i32_0, %c0_i32_1 : i32, i32, i32
  }
  func.func @transform_1(%arg0: i32) -> (i32, i32) {
    %c0_i32 = arith.constant 0 : i32
    %c0_i32_0 = arith.constant 0 : i32
    %c0_i32_1 = arith.constant 0 : i32
    return %c0_i32, %c0_i32_0 : i32, i32
  }
  func.func @transform_2(%arg0: i32) -> (i32, i32) {
    %c0_i32 = arith.constant 0 : i32
    %c0_i32_0 = arith.constant 0 : i32
    return %c0_i32, %arg0 : i32, i32
  }
  func.func @transform_3(%arg0: i32) -> (i32, i32) {
    %c0_i32 = arith.constant 0 : i32
    %c0_i32_0 = arith.constant 0 : i32
    return %c0_i32, %arg0 : i32, i32
  }
}

</mosaic_0001>

<bundles_post_ra>
// kernel: upsample.1
= control target key start
LH: loop header
LB: loop body
LE: loop exit
PB: predicated region body
PF: predicated region fallthrough
CT: control target
= control target key end

     0   :  { %v899_v3 = vmov 0   ;;  %vm49_vm0 = vcmask 1043456   ;;  %vm45_vm1 = vcmask 64512   ;;  %s1203_s2 = inlined_call_operand.vmem [shape: bf16[36,512], index: 2, kind: input, shape index: {}]   ;;  %s1204_s1 = inlined_call_operand.vmem [shape: f32[4,1], index: 1, kind: input, shape index: {}]   ;;  %s1205_s0 = inlined_call_operand.vmem [shape: bf16[8,4,8], index: 0, kind: input, shape index: {}]   ;;  %s1206_s3 = inlined_call_operand.vmem [shape: f32[16,512], index: 3, kind: output, shape index: {}]  }
   0x1   :  { %v781_v0 = vld [vmem:[%s1203_s2 + $0x10] sm:$0xc]  ;;  %v883_v1 = vld [vmem:[%s1203_s2 + $0x1c] sm:$0x30]  ;;  %v881_v2 = vld [vmem:[%s1203_s2 + $0x14] sm:$0xc]  ;;  %898 = vset.pattern.permute.xlu0 %v899_v3 }
   0x2   :  { %v782_v4 = vor.u32 %v883_v1, %v781_v0  ;;  %v783_v5 = vld [vmem:[%s1203_s2 + $0x20] sm:$0x30]  ;;  %v789_v6 = vld [vmem:[%s1203_s2 + $0x18] sm:$0xc]  ;;  %v884_v7 = vld [vmem:[%s1203_s2 + $0x24] sm:$0x30] }
   0x3   :  { %v786_v8 = vor.u32 %v881_v2, %v783_v5  ;;  %v790_v9 = vor.u32 %v884_v7, %v789_v6  ;;  %v882_v10 = vld [vmem:[%s1203_s2 + $0x1c] sm:$0xc]  ;;  %v791_v11 = vld [vmem:[%s1203_s2 + $0x28] sm:$0x30]  ;;  %v17_v15 = vld [vmem:[%s1203_s2] sm:$0xff] }
   0x4   :  { %v41_v12 = vrot.slane %v782_v4, 2  ;;  %v794_v13 = vor.u32 %v882_v10, %v791_v11  ;;  %v18_v14 = vld [vmem:[%s1203_s2 + $0x8] sm:$0xff]  ;;  %v15_v21 = vld [vmem:[%s1204_s1] sm:$0xf]  ;;  %v116_v24 = vunpack.c.l.b16 %v17_v15  ;;  %v117_v25 = vunpack.c.h.b16 %v17_v15  ;;  %v888_v52 = vld [vmem:[%s1203_s2 + $0x14] sm:$0x30] }
   0x5   :  { %v42_v16 = vrot.slane %v786_v8, 2  ;;  %v43_v17 = vrot.slane %v790_v9, 2  ;;  %v118_v18 = vunpack.c.l.b16 %v18_v14  ;;  %v119_v19 = vunpack.c.h.b16 %v18_v14  ;;  %v213_v20 = vld [vmem:[%s1203_s2 + $0x28] sm:$0xff]  ;;  %v212_v26 = vld [vmem:[%s1203_s2 + $0x20] sm:$0xff]  ;;  %193 = vperm.xlu0 %898, %v15_v21   ;;  %v821_v54 = vld [vmem:[%s1203_s2 + $0x18] sm:$0x30] }
   0x6   :  { %v51_v22 = vsel %vm49_vm0, %v41_v12, 0  ;;  %v44_v23 = vrot.slane %v794_v13, 2  ;;  %v778_v29 = vld [vmem:[%s1205_s0 + $0x2] sm:$0x3]  ;;  %v120_v33 = vpack.c.b16 %v116_v24, %v116_v24  ;;  %v121_v34 = vpack.c.b16 %v117_v25, %v117_v25  ;;  %v819_v50 = vld [vmem:[%s1203_s2 + $0x8] sm:$0xc] }
   0x7   :  { %69 = vmatpush.bf16.msra.mxu0 %v51_v22  ;;  %v54_v27 = vsel %vm49_vm0, %v42_v16, 0  ;;  %v57_v28 = vsel %vm49_vm0, %v43_v17, 0  ;;  %v122_v30 = vpack.c.b16 %v118_v18, %v118_v18  ;;  %v123_v31 = vpack.c.b16 %v119_v19, %v119_v19  ;;  %v886_v53 = vld [vmem:[%s1203_s2 + $0xc] sm:$0xc]  ;;  %v811_v55 = vld [vmem:[%s1203_s2] sm:$0xc] }
   0x8   :  { %82 = vmatpush.bf16.msra.mxu1 %v54_v27  ;;  %95 = vmatpush.bf16.msra.mxu2 %v57_v28  ;;  %v60_v32 = vsel %vm49_vm0, %v44_v23, 0  ;;  %v218_v35 = vunpack.c.l.b16 %v213_v20  ;;  %v219_v38 = vunpack.c.h.b16 %v213_v20  ;;  %v216_v39 = vunpack.c.l.b16 %v212_v26  ;;  %v887_v56 = vld [vmem:[%s1203_s2 + $0xc] sm:$0x30]  ;;  %v885_v57 = vld [vmem:[%s1203_s2 + $0x4] sm:$0xc]  ;;  %v407_v8 = vld [vmem:[%s1203_s2 + $0x38] sm:$0xff] }
   0x9   :  { %108 = vmatpush.bf16.msra.mxu3 %v60_v32  ;;  %v134_v36 = vsel %vm49_vm0, %v122_v30, 0  ;;  %v137_v37 = vsel %vm49_vm0, %v123_v31, 0  ;;  %v128_v40 = vsel %vm49_vm0, %v120_v33, 0  ;;  %v131_v41 = vsel %vm49_vm0, %v121_v34, 0  ;;  %v813_v58 = vld [vmem:[%s1203_s2 + $0x10] sm:$0x30] }
   0xa   :  { %795 = vmatmul.msk.bf16.vlgmr.msra.gmra.mxu0 %vm45_vm1, %v778_v29  ;;  %v222_v42 = vpack.c.b16 %v218_v35, %v218_v35  ;;  %v217_v43 = vunpack.c.h.b16 %v212_v26  ;;  %v223_v44 = vpack.c.b16 %v219_v38, %v219_v38  ;;  %v220_v45 = vpack.c.b16 %v216_v39, %v216_v39  ;;  %v16_v2 = vld [vmem:[%s1205_s0] sm:$0x3]  ;;  %v406_v9 = vld [vmem:[%s1203_s2 + $0x30] sm:$0xff]  ;;  %v804_v17 = vld [vmem:[%s1205_s0 + $0x6] sm:$0x3] }
   0xb   :  { %796 = vmatmul.msk.bf16.vlgmr.msra.gmra.mxu1 %vm45_vm1, %v778_v29  ;;  %797 = vmatmul.msk.bf16.vlgmr.msra.gmra.mxu2 %vm45_vm1, %v778_v29  ;;  %v820_v59 = vor.u32 %v888_v52, %v819_v50  ;;  %v824_v60 = vor.u32 %v886_v53, %v821_v54  ;;  %v812_v61 = vor.u32 %v887_v56, %v811_v55  ;;  %v412_v10 = vunpack.c.l.b16 %v407_v8  ;;  %v845_v23 = vld [vmem:[%s1203_s2 + $0x18] sm:$0xc]  ;;  %v892_v24 = vld [vmem:[%s1203_s2 + $0x24] sm:$0x30]  ;;  %v890_v25 = vld [vmem:[%s1203_s2 + $0x1c] sm:$0xc] }
   0xc   :  { %172 = vmatpush.bf16.msrb.mxu2 %v134_v36  ;;  %798 = vmatmul.msk.bf16.vlgmr.msra.gmra.mxu3 %vm45_vm1, %v778_v29  ;;  %v975_v46 = vsel %vm49_vm0, %v222_v42, 0  ;;  %v221_v47 = vpack.c.b16 %v217_v43, %v217_v43  ;;  %v978_v48 = vsel %vm49_vm0, %v223_v44, 0  ;;  %v981_v49 = vsel %vm49_vm0, %v220_v45, 0  ;;  %v847_v26 = vld [vmem:[%s1203_s2 + $0x28] sm:$0x30] }
   0xd   :  { %146 = vmatpush.bf16.msrb.mxu0 %v128_v40  ;;  %185 = vmatpush.bf16.msrb.mxu3 %v137_v37  ;;  %v816_v62 = vor.u32 %v885_v57, %v813_v58  ;;  %v309_v63 = vrot.slane %v820_v59, 2  ;;  %v310_v0 = vrot.slane %v824_v60, 2  ;;  %v307_v1 = vrot.slane %v812_v61, 2  ;;  %v837_v27 = vld [vmem:[%s1203_s2 + $0x10] sm:$0xc] }
   0xe   :  { %159 = vmatpush.bf16.msrb.mxu1 %v131_v41  ;;  %v989_v51 = vsel %vm49_vm0, %v221_v47, 0  ;;  %v413_v11 = vunpack.c.h.b16 %v407_v8  ;;  %v410_v12 = vunpack.c.l.b16 %v406_v9  ;;  %v411_v13 = vunpack.c.h.b16 %v406_v9  ;;  %v891_v28 = vld [vmem:[%s1203_s2 + $0x1c] sm:$0x30]  ;;  %v889_v29 = vld [vmem:[%s1203_s2 + $0x14] sm:$0xc] }
   0xf   :  { %v308_v3 = vrot.slane %v816_v62, 2  ;;  %v321_v4 = vsel %vm49_vm0, %v309_v63, 0  ;;  %v324_v5 = vsel %vm49_vm0, %v310_v0, 0  ;;  %v315_v6 = vsel %vm49_vm0, %v307_v1, 0  ;;  %v839_v30 = vld [vmem:[%s1203_s2 + $0x20] sm:$0x30] }
  0x10   :  { %272 = vmatpush.bf16.msra.mxu2 %v975_v46  ;;  %v416_v14 = vpack.c.b16 %v412_v10, %v412_v10  ;;  %v417_v15 = vpack.c.b16 %v413_v11, %v413_v11  ;;  %v414_v16 = vpack.c.b16 %v410_v12, %v410_v12  ;;  %v415_v18 = vpack.c.b16 %v411_v13, %v411_v13  ;;  %v803_v38 = vld [vmem:[%s1205_s0 + $0x4] sm:$0x3]  ;;  %v867_v44 = vld [vmem:[%s1203_s2 + $0x38] sm:$0xc]  ;;  %v896_v45 = vld [vmem:[%s1203_s2 + $0x44] sm:$0x30] }
  0x11   :  { %285 = vmatpush.bf16.msra.mxu3 %v978_v48  ;;  %246 = vmatpush.bf16.msra.mxu0 %v981_v49  ;;  %v318_v7 = vsel %vm49_vm0, %v308_v3, 0  ;;  %v846_v31 = vor.u32 %v892_v24, %v845_v23  ;;  %v850_v32 = vor.u32 %v890_v25, %v847_v26  ;;  %v838_v33 = vor.u32 %v891_v28, %v837_v27  ;;  %v894_v47 = vld [vmem:[%s1203_s2 + $0x3c] sm:$0xc]  ;;  %v869_v52 = vld [vmem:[%s1203_s2 + $0x48] sm:$0x30] }
  0x12   :  { %259 = vmatpush.bf16.msra.mxu1 %v989_v51  ;;  %v428_v19 = vsel %vm49_vm0, %v416_v14, 0  ;;  %v431_v20 = vsel %vm49_vm0, %v417_v15, 0  ;;  %v422_v21 = vsel %vm49_vm0, %v414_v16, 0  ;;  %v425_v22 = vsel %vm49_vm0, %v415_v18, 0  ;;  %v859_v53 = vld [vmem:[%s1203_s2 + $0x30] sm:$0xc] }
  0x13   :  { %v842_v34 = vor.u32 %v889_v29, %v839_v30  ;;  %v503_v35 = vrot.slane %v846_v31, 2  ;;  %v504_v36 = vrot.slane %v850_v32, 2  ;;  %v501_v37 = vrot.slane %v838_v33, 2  ;;  %v895_v54 = vld [vmem:[%s1203_s2 + $0x3c] sm:$0x30] }
  0x14   :  { %v868_v50 = vor.u32 %v896_v45, %v867_v44  ;;  %v872_v55 = vor.u32 %v894_v47, %v869_v52  ;;  %v860_v56 = vor.u32 %v895_v54, %v859_v53  ;;  %v893_v57 = vld [vmem:[%s1203_s2 + $0x34] sm:$0xc]  ;;  %v861_v58 = vld [vmem:[%s1203_s2 + $0x40] sm:$0x30] }
  0x15   :  { %v502_v39 = vrot.slane %v842_v34, 2  ;;  %v515_v40 = vsel %vm49_vm0, %v503_v35, 0  ;;  %v518_v41 = vsel %vm49_vm0, %v504_v36, 0  ;;  %v509_v42 = vsel %vm49_vm0, %v501_v37, 0 }
  0x16   :  { %v608_v59 = vrot.slane %v868_v50, 2  ;;  %v864_v60 = vor.u32 %v893_v57, %v861_v58  ;;  %v609_v61 = vrot.slane %v872_v55, 2  ;;  %v606_v62 = vrot.slane %v860_v56, 2 }
  0x17   :  { %v512_v43 = vsel %vm49_vm0, %v502_v39, 0 }
  0x18   :  { %v620_v63 = vsel %vm49_vm0, %v608_v59, 0  ;;  %v607_v0 = vrot.slane %v864_v60, 2  ;;  %v623_v1 = vsel %vm49_vm0, %v609_v61, 0 }
  0x1a   :  { %799 = vmatmul.msk.bf16.vlgmr.msrb.gmra.mxu0 %vm45_vm1, %v16_v2  ;;  %v617_v3 = vsel %vm49_vm0, %v607_v0, 0 }
  0x1b   :  { %800 = vmatmul.msk.bf16.vlgmr.msrb.gmra.mxu1 %vm45_vm1, %v16_v2  ;;  %801 = vmatmul.msk.bf16.vlgmr.msrb.gmra.mxu2 %vm45_vm1, %v16_v2 }
  0x1c   :  { %802 = vmatmul.msk.bf16.vlgmr.msrb.gmra.mxu3 %vm45_vm1, %v16_v2  ;;  %359 = vmatpush.bf16.msrb.mxu2 %v321_v4  ;;  %v614_v2 = vsel %vm49_vm0, %v606_v62, 0  ;;  %v830_v4 = vld [vmem:[%s1205_s0 + $0xa] sm:$0x3] }
  0x1d   :  { %372 = vmatpush.bf16.msrb.mxu3 %v324_v5  ;;  %333 = vmatpush.bf16.msrb.mxu0 %v315_v6  ;;  %v829_v5 = vld [vmem:[%s1205_s0 + $0x8] sm:$0x3]  ;;  %v856_v6 = vld [vmem:[%s1205_s0 + $0xe] sm:$0x3] }
  0x1e   :  { %346 = vmatpush.bf16.msrb.mxu1 %v318_v7 }
  0x2a   :  { %805 = vmatmul.msk.bf16.vlgmr.msra.gmra.mxu0 %vm45_vm1, %v804_v17 }
  0x2b   :  { %806 = vmatmul.msk.bf16.vlgmr.msra.gmra.mxu1 %vm45_vm1, %v804_v17  ;;  %807 = vmatmul.msk.bf16.vlgmr.msra.gmra.mxu2 %vm45_vm1, %v804_v17 }
  0x2c   :  { %808 = vmatmul.msk.bf16.vlgmr.msra.gmra.mxu3 %vm45_vm1, %v804_v17  ;;  %466 = vmatpush.bf16.msra.mxu2 %v428_v19 }
  0x2d   :  { %479 = vmatpush.bf16.msra.mxu3 %v431_v20  ;;  %440 = vmatpush.bf16.msra.mxu0 %v422_v21 }
  0x2e   :  { %453 = vmatpush.bf16.msra.mxu1 %v425_v22 }
  0x3a   :  { %825 = vmatmul.msk.bf16.vlgmr.msrb.gmra.mxu0 %vm45_vm1, %v803_v38 }
  0x3b   :  { %826 = vmatmul.msk.bf16.vlgmr.msrb.gmra.mxu1 %vm45_vm1, %v803_v38  ;;  %827 = vmatmul.msk.bf16.vlgmr.msrb.gmra.mxu2 %vm45_vm1, %v803_v38 }
  0x3c   :  { %828 = vmatmul.msk.bf16.vlgmr.msrb.gmra.mxu3 %vm45_vm1, %v803_v38  ;;  %553 = vmatpush.bf16.msrb.mxu2 %v515_v40 }
  0x3d   :  { %566 = vmatpush.bf16.msrb.mxu3 %v518_v41  ;;  %527 = vmatpush.bf16.msrb.mxu0 %v509_v42 }
  0x3e   :  { %540 = vmatpush.bf16.msrb.mxu1 %v512_v43 }
  0x4a   :  { %831 = vmatmul.msk.bf16.vlgmr.msra.gmra.mxu0 %vm45_vm1, %v830_v4 }
  0x4b   :  { %832 = vmatmul.msk.bf16.vlgmr.msra.gmra.mxu1 %vm45_vm1, %v830_v4  ;;  %833 = vmatmul.msk.bf16.vlgmr.msra.gmra.mxu2 %vm45_vm1, %v830_v4 }
  0x4c   :  { %834 = vmatmul.msk.bf16.vlgmr.msra.gmra.mxu3 %vm45_vm1, %v830_v4  ;;  %658 = vmatpush.bf16.msra.mxu2 %v620_v63 }
  0x4d   :  { %671 = vmatpush.bf16.msra.mxu3 %v623_v1  ;;  %632 = vmatpush.bf16.msra.mxu0 %v614_v2 }
  0x4e   :  { %645 = vmatpush.bf16.msra.mxu1 %v617_v3 }
  0x5a   :  { %851 = vmatmul.msk.bf16.vlgmr.msrb.gmra.mxu0 %vm45_vm1, %v829_v5 }
  0x5b   :  { %852 = vmatmul.msk.bf16.vlgmr.msrb.gmra.mxu1 %vm45_vm1, %v829_v5  ;;  %853 = vmatmul.msk.bf16.vlgmr.msrb.gmra.mxu2 %vm45_vm1, %v829_v5 }
  0x5c   :  { %854 = vmatmul.msk.bf16.vlgmr.msrb.gmra.mxu3 %vm45_vm1, %v829_v5  ;;  %735 = vmatpush.bf16.msrb.mxu2 %v975_v46  ;;  %v855_v46 = vld [vmem:[%s1205_s0 + $0xc] sm:$0x3] }
  0x5d   :  { %748 = vmatpush.bf16.msrb.mxu3 %v978_v48  ;;  %709 = vmatpush.bf16.msrb.mxu0 %v981_v49 }
  0x5e   :  { %722 = vmatpush.bf16.msrb.mxu1 %v989_v51 }
  0x6a   :  { %873 = vmatmul.msk.bf16.vlgmr.msra.gmra.mxu0 %vm45_vm1, %v856_v6 }
  0x6b   :  { %874 = vmatmul.msk.bf16.vlgmr.msra.gmra.mxu1 %vm45_vm1, %v856_v6  ;;  %875 = vmatmul.msk.bf16.vlgmr.msra.gmra.mxu2 %vm45_vm1, %v856_v6 }
  0x6c   :  { %876 = vmatmul.msk.bf16.vlgmr.msra.gmra.mxu3 %vm45_vm1, %v856_v6 }
  0x77   :  { %v1137_v11 = vpop.permute.xlu0 %193 }
  0x7a   :  { %877 = vmatmul.msk.bf16.vlgmr.msrb.gmra.mxu0 %vm45_vm1, %v855_v46 }
  0x7b   :  { %878 = vmatmul.msk.bf16.vlgmr.msrb.gmra.mxu1 %vm45_vm1, %v855_v46  ;;  %879 = vmatmul.msk.bf16.vlgmr.msrb.gmra.mxu2 %vm45_vm1, %v855_v46 }
  0x7c   :  { %880 = vmatmul.msk.bf16.vlgmr.msrb.gmra.mxu3 %vm45_vm1, %v855_v46 }
  0x87   :  { %v71_v48 = vpop.f32.mrf.mxu0 }
  0x88   :  { %v84_v49 = vpop.f32.mrf.mxu1 }
  0x8e   :  { %v97_v51 = vpop.f32.mrf.mxu2 }
  0x8f   :  { %v110_v7 = vpop.f32.mrf.mxu3  ;;  %v73_v8 = vpop.f32.mrf.mxu0 }
  0x90   :  { %v86_v9 = vpop.f32.mrf.mxu1 }
  0x96   :  { %v99_v10 = vpop.f32.mrf.mxu2 }
  0x97   :  { %v112_v12 = vpop.f32.mrf.mxu3  ;;  %v148_v13 = vpop.f32.mrf.mxu0 }
  0x98   :  { %v149_v14 = vadd.f32 %v148_v13, %v71_v48  ;;  %v161_v15 = vpop.f32.mrf.mxu1 }
  0x99   :  { %v162_v16 = vadd.f32 %v161_v15, %v84_v49 }
  0x9a   :  { %v196_v17 = vadd.f32 %v1137_v11, %v149_v14 }
  0x9b   :  { %v197_v18 = vadd.f32 %v1137_v11, %v162_v16 }
  0x9c   :  { %200 = vst [vmem:[%s1206_s3] sm:$0xf] %v196_v17 }
  0x9d   :  { %201 = vst [vmem:[%s1206_s3 + $0x8] sm:$0xf] %v197_v18 }
  0x9e   :  { %v174_v19 = vpop.f32.mrf.mxu2 }
  0x9f   :  { %v175_v20 = vadd.f32 %v174_v19, %v97_v51  ;;  %v187_v21 = vpop.f32.mrf.mxu3  ;;  %v150_v22 = vpop.f32.mrf.mxu0 }
  0xa0   :  { %v188_v23 = vadd.f32 %v187_v21, %v110_v7  ;;  %v163_v24 = vpop.f32.mrf.mxu1 }
  0xa1   :  { %v198_v25 = vadd.f32 %v1137_v11, %v175_v20 }
  0xa2   :  { %v199_v26 = vadd.f32 %v1137_v11, %v188_v23 }
  0xa3   :  { %202 = vst [vmem:[%s1206_s3 + $0x10] sm:$0xf] %v198_v25 }
  0xa4   :  { %203 = vst [vmem:[%s1206_s3 + $0x18] sm:$0xf] %v199_v26 }
  0xa6   :  { %v176_v27 = vpop.f32.mrf.mxu2 }
  0xa7   :  { %v189_v28 = vpop.f32.mrf.mxu3  ;;  %v248_v29 = vpop.f32.mrf.mxu0 }
  0xa8   :  { %v261_v30 = vpop.f32.mrf.mxu1 }
  0xae   :  { %v274_v31 = vpop.f32.mrf.mxu2 }
  0xaf   :  { %v287_v32 = vpop.f32.mrf.mxu3  ;;  %v250_v33 = vpop.f32.mrf.mxu0 }
  0xb0   :  { %v263_v34 = vpop.f32.mrf.mxu1 }
  0xb6   :  { %v276_v35 = vpop.f32.mrf.mxu2 }
  0xb7   :  { %v289_v36 = vpop.f32.mrf.mxu3  ;;  %v335_v37 = vpop.f32.mrf.mxu0 }
  0xb8   :  { %v336_v38 = vadd.f32 %v335_v37, %v248_v29  ;;  %v348_v39 = vpop.f32.mrf.mxu1 }
  0xb9   :  { %v349_v40 = vadd.f32 %v348_v39, %v261_v30 }
  0xba   :  { %v378_v41 = vadd.f32 %v336_v38, %v1137_v11 }
  0xbb   :  { %v379_v42 = vadd.f32 %v349_v40, %v1137_v11 }
  0xbc   :  { %v386_v43 = vrot.slane %v378_v41, 4 }
  0xbd   :  { %v387_v44 = vrot.slane %v379_v42, 4 }
  0xbe   :  { %394 = vst [vmem:[%s1206_s3] sm:$0xf0] %v386_v43  ;;  %v361_v45 = vpop.f32.mrf.mxu2 }
  0xbf   :  { %395 = vst [vmem:[%s1206_s3 + $0x8] sm:$0xf0] %v387_v44  ;;  %v362_v47 = vadd.f32 %v361_v45, %v274_v31  ;;  %v374_v50 = vpop.f32.mrf.mxu3  ;;  %v337_v52 = vpop.f32.mrf.mxu0 }
  0xc0   :  { %v375_v53 = vadd.f32 %v374_v50, %v287_v32  ;;  %v350_v54 = vpop.f32.mrf.mxu1 }
  0xc1   :  { %v380_v55 = vadd.f32 %v362_v47, %v1137_v11 }
  0xc2   :  { %v381_v56 = vadd.f32 %v375_v53, %v1137_v11 }
  0xc3   :  { %v388_v57 = vrot.slane %v380_v55, 4 }
  0xc4   :  { %v389_v58 = vrot.slane %v381_v56, 4 }
  0xc5   :  { %396 = vst [vmem:[%s1206_s3 + $0x10] sm:$0xf0] %v388_v57 }
  0xc6   :  { %397 = vst [vmem:[%s1206_s3 + $0x18] sm:$0xf0] %v389_v58  ;;  %v363_v59 = vpop.f32.mrf.mxu2 }
  0xc7   :  { %v376_v60 = vpop.f32.mrf.mxu3  ;;  %v442_v61 = vpop.f32.mrf.mxu0 }
  0xc8   :  { %v455_v62 = vpop.f32.mrf.mxu1 }
  0xce   :  { %v468_v63 = vpop.f32.mrf.mxu2 }
  0xcf   :  { %v481_v0 = vpop.f32.mrf.mxu3  ;;  %v444_v1 = vpop.f32.mrf.mxu0 }
  0xd0   :  { %v457_v2 = vpop.f32.mrf.mxu1 }
  0xd6   :  { %v470_v3 = vpop.f32.mrf.mxu2 }
  0xd7   :  { %v483_v4 = vpop.f32.mrf.mxu3  ;;  %v529_v5 = vpop.f32.mrf.mxu0 }
  0xd8   :  { %v530_v6 = vadd.f32 %v529_v5, %v442_v61  ;;  %v542_v46 = vpop.f32.mrf.mxu1 }
  0xd9   :  { %v543_v48 = vadd.f32 %v542_v46, %v455_v62 }
  0xda   :  { %v572_v49 = vadd.f32 %v530_v6, %v1137_v11 }
  0xdb   :  { %v573_v51 = vadd.f32 %v543_v48, %v1137_v11 }
  0xdc   :  { %576 = vst [vmem:[%s1206_s3 + $0x20] sm:$0xf] %v572_v49 }
  0xdd   :  { %577 = vst [vmem:[%s1206_s3 + $0x28] sm:$0xf] %v573_v51 }
  0xde   :  { %v555_v7 = vpop.f32.mrf.mxu2 }
  0xdf   :  { %v556_v8 = vadd.f32 %v555_v7, %v468_v63  ;;  %v568_v9 = vpop.f32.mrf.mxu3  ;;  %v531_v10 = vpop.f32.mrf.mxu0 }
  0xe0   :  { %v569_v12 = vadd.f32 %v568_v9, %v481_v0  ;;  %v544_v13 = vpop.f32.mrf.mxu1 }
  0xe1   :  { %v574_v14 = vadd.f32 %v556_v8, %v1137_v11 }
  0xe2   :  { %v575_v15 = vadd.f32 %v569_v12, %v1137_v11 }
  0xe3   :  { %578 = vst [vmem:[%s1206_s3 + $0x30] sm:$0xf] %v574_v14 }
  0xe4   :  { %579 = vst [vmem:[%s1206_s3 + $0x38] sm:$0xf] %v575_v15 }
  0xe6   :  { %v557_v16 = vpop.f32.mrf.mxu2 }
  0xe7   :  { %v570_v17 = vpop.f32.mrf.mxu3  ;;  %v634_v18 = vpop.f32.mrf.mxu0 }
  0xe8   :  { %v647_v19 = vpop.f32.mrf.mxu1 }
  0xee   :  { %v660_v20 = vpop.f32.mrf.mxu2 }
  0xef   :  { %v673_v21 = vpop.f32.mrf.mxu3  ;;  %v636_v22 = vpop.f32.mrf.mxu0 }
  0xf0   :  { %v649_v23 = vpop.f32.mrf.mxu1 }
  0xf6   :  { %v662_v24 = vpop.f32.mrf.mxu2 }
  0xf7   :  { %v675_v25 = vpop.f32.mrf.mxu3  ;;  %v711_v26 = vpop.f32.mrf.mxu0 }
  0xf8   :  { %v712_v27 = vadd.f32 %v711_v26, %v634_v18  ;;  %v724_v28 = vpop.f32.mrf.mxu1 }
  0xf9   :  { %v725_v29 = vadd.f32 %v724_v28, %v647_v19 }
  0xfa   :  { %v754_v30 = vadd.f32 %v712_v27, %v1137_v11 }
  0xfb   :  { %v755_v31 = vadd.f32 %v725_v29, %v1137_v11 }
  0xfc   :  { %v762_v32 = vrot.slane %v754_v30, 4 }
  0xfd   :  { %v763_v33 = vrot.slane %v755_v31, 4 }
  0xfe   :  { %770 = vst [vmem:[%s1206_s3 + $0x20] sm:$0xf0] %v762_v32  ;;  %v737_v34 = vpop.f32.mrf.mxu2 }
  0xff   :  { %771 = vst [vmem:[%s1206_s3 + $0x28] sm:$0xf0] %v763_v33  ;;  %v738_v35 = vadd.f32 %v737_v34, %v660_v20  ;;  %v750_v36 = vpop.f32.mrf.mxu3  ;;  %v713_v37 = vpop.f32.mrf.mxu0 }
 0x100   :  { %v751_v38 = vadd.f32 %v750_v36, %v673_v21  ;;  %v726_v39 = vpop.f32.mrf.mxu1 }
 0x101   :  { %v756_v40 = vadd.f32 %v738_v35, %v1137_v11 }
 0x102   :  { %v757_v41 = vadd.f32 %v751_v38, %v1137_v11 }
 0x103   :  { %v764_v42 = vrot.slane %v756_v40, 4 }
 0x104   :  { %v765_v43 = vrot.slane %v757_v41, 4 }
 0x105   :  { %772 = vst [vmem:[%s1206_s3 + $0x30] sm:$0xf0] %v764_v42 }
 0x106   :  { %773 = vst [vmem:[%s1206_s3 + $0x38] sm:$0xf0] %v765_v43  ;;  %v739_v44 = vpop.f32.mrf.mxu2 }
 0x107   :  { %v752_v45 = vpop.f32.mrf.mxu3 }

</bundles_post_ra>
